<compile_context>
chip_gen: v7x
topology: tpu7x:2x2x1
jax: 0.10.0
libtpu: 0.0.40
codegen_flags: <defaults>
</compile_context>

<pallas_src>
import jax
import jax.numpy as jnp
from jax.experimental import pallas as pl
from jax.experimental.pallas import tpu as pltpu

_LANE = 128
_SUBLANE = 8


# ----------------------------------------------------------------------------
# Kernels
# ----------------------------------------------------------------------------
def _make_vpu_kernel(cin, cout):
    """Small-channel path: unrolled broadcast MAC on the VPU over dense slabs.

    x_ref: (Cin,  s_tile, 128) VMEM
    w_ref: (Cout, Cin)         SMEM (scalar reads)
    b_ref: (Cout,)             SMEM (scalar reads)
    o_ref: (Cout, s_tile, 128) VMEM (full-vreg, unmasked stores)
    """

    def kernel(x_ref, w_ref, b_ref, o_ref):
        for co in range(cout):
            # Bias folded into the first MAC; per-ci slabs streamed so live
            # ranges stay at a few vregs (no full-tile f32 copy up front).
            acc = x_ref[0].astype(jnp.float32) * w_ref[co, 0] + b_ref[co]
            for ci in range(1, cin):
                acc = acc + x_ref[ci].astype(jnp.float32) * w_ref[co, ci]
            o_ref[co] = acc.astype(o_ref.dtype)

    return kernel


def _mxu_kernel(x_ref, w_ref, b_ref, o_ref):
    """Large-channel path: MXU matmul with resident weight/bias blocks.

    x_ref: (Cin, t_hw)  VMEM
    w_ref: (Cout, Cin)  VMEM (constant index map -> resident)
    b_ref: (Cout, 1)    VMEM (resident)
    o_ref: (Cout, t_hw) VMEM
    """
    acc = jnp.dot(w_ref[...], x_ref[...], preferred_element_type=jnp.float32)
    o_ref[...] = (acc + b_ref[...].astype(jnp.float32)).astype(o_ref.dtype)


# ----------------------------------------------------------------------------
# Tile sizing (generation aware)
# ----------------------------------------------------------------------------
def _vmem_tile_budget_bytes():
    """Bytes allowed for the double-buffered in+out tiles of one grid step."""
    cap = None
    try:
        cap = getattr(pltpu.get_tpu_info(), "vmem_capacity_bytes", None)
    except Exception:
        cap = None
    if cap is None:
        cap = 64 * 1024 * 1024  # conservative (v7x physical VMEM)
    # ~16 MiB on v7x (64 MiB phys), capped at ~24 MiB on v5e/v6e (128 MiB phys).
    return min(cap // 4, 24 * 1024 * 1024)


def _pick_s_tile(S, cin, cout, itemsize, n_batch, *, max_lanes=256 * 1024):
    """Sublane count (multiple of 8) of the spatial tile; divides S."""
    if S <= _SUBLANE:
        return S  # full-extent block (allowed even if not a multiple of 8)

    budget = _vmem_tile_budget_bytes()
    bytes_per_sublane = 2 * (cin + cout) * _LANE * itemsize  # x2: double buffer
    max_s = min(S, max_lanes // _LANE, max(budget // bytes_per_sublane, _SUBLANE))

    # v7x megacore: keep >= 2 grid steps so both TensorCores get work.
    if n_batch == 1 and max_s >= S:
        max_s = max(_SUBLANE, S // 2)

    max_s = max(_SUBLANE, (max_s // _SUBLANE) * _SUBLANE)

    # Largest multiple of 8 that divides S (S is a multiple of 8 here).
    best = _SUBLANE
    d = _SUBLANE
    while d <= max_s:
        if S % d == 0:
            best = d
        d += _SUBLANE
    return best


# ----------------------------------------------------------------------------
# Wrapper
# ----------------------------------------------------------------------------
def outconv_forward(x_nchw, weight, bias, *, interpret=False):
    """1x1 Conv2d forward (equivalent to nn.Conv2d(Cin, Cout, kernel_size=1)).

    x_nchw: (N, Cin, H, W)
    weight: (Cout, Cin, 1, 1)   (PyTorch Conv2d weight layout)
    bias:   (Cout,)
    returns (N, Cout, H, W)
    """
    N, Cin, H, W = x_nchw.shape
    Cout = weight.shape[0]
    HW = H * W
    out_dtype = x_nchw.dtype
    itemsize = jnp.dtype(out_dtype).itemsize

    w2 = weight.reshape(Cout, Cin)

    # Pad the spatial extent so the lane axis is a dense multiple of 128, and
    # (when the sublane extent exceeds 8) the sublane axis is a multiple of 8.
    # This keeps every tile (8,128)-dense with unmasked stores; the pad is a
    # single HBM copy and only happens for non-aligned images.
    HW_pad = -(-HW // _LANE) * _LANE
    S = HW_pad // _LANE
    if S > _SUBLANE and S % _SUBLANE != 0:
        S = -(-S // _SUBLANE) * _SUBLANE
        HW_pad = S * _LANE

    x3 = x_nchw.reshape(N, Cin, HW)  # free reshape (contiguous trailing dims)
    if HW_pad != HW:
        x3 = jnp.pad(x3, ((0, 0), (0, 0), (0, HW_pad - HW)))

    s_tile = _pick_s_tile(S, Cin, Cout, itemsize, N)
    grid = (N, S // s_tile)

    vmem_limit = _vmem_tile_budget_bytes() + 8 * 1024 * 1024
    compiler_params = pltpu.CompilerParams(
        dimension_semantics=("parallel", "parallel"),
        vmem_limit_bytes=vmem_limit,
    )

    # Roofline-based dispatch: the VPU path costs ~Cin*Cout MACs per 1024
    # outputs; once channels are big enough, the otherwise-idle MXU handles it
    # at memory speed instead.
    use_mxu = (min(Cin, Cout) >= 8) and (Cin >= 16)

    if not use_mxu:
        # --- VPU path: dense (s_tile, 128) slabs, weights/bias in SMEM. ---
        x4 = x3.reshape(N, Cin, S, _LANE)  # free row-major split
        out4 = pl.pallas_call(
            _make_vpu_kernel(Cin, Cout),
            out_shape=jax.ShapeDtypeStruct((N, Cout, S, _LANE), out_dtype),
            grid_spec=pltpu.PrefetchScalarGridSpec(
                num_scalar_prefetch=0,
                grid=grid,
                in_specs=[
                    # batch dim squeezed; kernel sees (Cin, s_tile, 128)
                    pl.BlockSpec((None, Cin, s_tile, _LANE),
                                 lambda n, j: (n, 0, j, 0)),
                    pl.BlockSpec(memory_space=pltpu.MemorySpace.SMEM),
                    pl.BlockSpec(memory_space=pltpu.MemorySpace.SMEM),
                ],
                out_specs=pl.BlockSpec((None, Cout, s_tile, _LANE),
                                       lambda n, j: (n, 0, j, 0)),
            ),
            compiler_params=compiler_params,
            interpret=interpret,
        )(x4, w2.astype(jnp.float32), bias.astype(jnp.float32))
        out3 = out4.reshape(N, Cout, HW_pad)
    else:
        # --- MXU path: (Cout,Cin) @ (Cin,t_hw), weight/bias resident in VMEM. ---
        # TODO(synk): optionally sweep pipeline_mode=pl.Buffered(3) on x if
        # per-step DMA setup shows as exposed latency for tiny tiles.
        t_hw = s_tile * _LANE
        out3 = pl.pallas_call(
            _mxu_kernel,
            out_shape=jax.ShapeDtypeStruct((N, Cout, HW_pad), out_dtype),
            grid_spec=pltpu.PrefetchScalarGridSpec(
                num_scalar_prefetch=0,
                grid=grid,
                in_specs=[
                    pl.BlockSpec((None, Cin, t_hw), lambda n, j: (n, 0, j)),
                    pl.BlockSpec((Cout, Cin), lambda n, j: (0, 0)),
                    pl.BlockSpec((Cout, 1), lambda n, j: (0, 0)),
                ],
                out_specs=pl.BlockSpec((None, Cout, t_hw),
                                       lambda n, j: (n, 0, j)),
            ),
            compiler_params=compiler_params,
            interpret=interpret,
        )(x3, w2, bias.reshape(Cout, 1).astype(jnp.float32))

    if HW_pad != HW:
        out3 = out3[:, :, :HW]
    return out3.reshape(N, Cout, H, W)


def init_outconv_params(key, in_channels, out_channels):
    """Deterministic init mimicking PyTorch Conv2d defaults (uniform +-1/sqrt(fan_in))."""
    kw, kb = jax.random.split(key)
    fan_in = in_channels * 1 * 1
    bound = 1.0 / jnp.sqrt(fan_in)
    weight = jax.random.uniform(
        kw, (out_channels, in_channels, 1, 1), jnp.float32, -bound, bound
    )
    bias = jax.random.uniform(kb, (out_channels,), jnp.float32, -bound, bound)
    return weight, bias


if __name__ == "__main__":
    key = jax.random.PRNGKey(0)
    k_x, k_p = jax.random.split(key)

    N, Cin, H, W = 2, 4, 16, 16
    Cout = 3

    x = jax.random.normal(k_x, (N, Cin, H, W), jnp.float32)
    weight, bias = init_outconv_params(k_p, Cin, Cout)

    out = jax.block_until_ready(outconv_forward(x, weight, bias))

    # Reference check against plain-JAX 1x1 conv.
    ref = (
        jnp.einsum("nchw,oc->nohw", x, weight.reshape(Cout, Cin))
        + bias.reshape(1, Cout, 1, 1)
    )
    assert out.shape == (N, Cout, H, W)
    assert jnp.allclose(out, ref, atol=1e-5, rtol=1e-5)

    print("KERNEL_OK")
</pallas_src>

<mosaic_0001>
module attributes {stable_mosaic.version = 11 : i64} {
  func.func @kernel(%arg0: i32, %arg1: i32, %arg2: memref<1x4x2x128xf32, #tpu.memory_space<vmem>>, %arg3: memref<3x4xf32, #tpu.memory_space<smem>>, %arg4: memref<3xf32, #tpu.memory_space<smem>>, %arg5: memref<1x3x2x128xf32, #tpu.memory_space<vmem>>) attributes {dimension_semantics = [#tpu.dimension_semantics<parallel>, #tpu.dimension_semantics<parallel>], iteration_bounds = array<i64: 2, 1>, scalar_prefetch = 0 : i64, scratch_operands = 0 : i64, tpu.core_type = #tpu.core_type<tc>, window_params = [{transform_indices = @transform_0, window_bounds = array<i64: 1, 4, 2, 128>}, {transform_indices = @transform_1, window_bounds = array<i64: 3, 4>}, {transform_indices = @transform_2, window_bounds = array<i64: 3>}, {transform_indices = @transform_3, window_bounds = array<i64: 1, 3, 2, 128>}]} {
    %c0 = arith.constant 0 : index
    %c0_0 = arith.constant 0 : index
    %c0_1 = arith.constant 0 : index
    %c0_2 = arith.constant 0 : index
    %0 = vector.load %arg2[%c0, %c0_0, %c0_1, %c0_2] : memref<1x4x2x128xf32, #tpu.memory_space<vmem>>, vector<1x1x2x128xf32>
    %1 = vector.shape_cast %0 : vector<1x1x2x128xf32> to vector<2x128xf32>
    %c0_3 = arith.constant 0 : index
    %c0_4 = arith.constant 0 : index
    %2 = memref.load %arg3[%c0_3, %c0_4] : memref<3x4xf32, #tpu.memory_space<smem>>
    %3 = vector.broadcast %2 : f32 to vector<2x128xf32>
    %4 = arith.mulf %1, %3 : vector<2x128xf32>
    %c0_5 = arith.constant 0 : index
    %5 = memref.load %arg4[%c0_5] : memref<3xf32, #tpu.memory_space<smem>>
    %6 = vector.broadcast %5 : f32 to vector<2x128xf32>
    %7 = arith.addf %4, %6 : vector<2x128xf32>
    %c0_6 = arith.constant 0 : index
    %c1 = arith.constant 1 : index
    %c0_7 = arith.constant 0 : index
    %c0_8 = arith.constant 0 : index
    %8 = vector.load %arg2[%c0_6, %c1, %c0_7, %c0_8] : memref<1x4x2x128xf32, #tpu.memory_space<vmem>>, vector<1x1x2x128xf32>
    %9 = vector.shape_cast %8 : vector<1x1x2x128xf32> to vector<2x128xf32>
    %c0_9 = arith.constant 0 : index
    %c1_10 = arith.constant 1 : index
    %10 = memref.load %arg3[%c0_9, %c1_10] : memref<3x4xf32, #tpu.memory_space<smem>>
    %11 = vector.broadcast %10 : f32 to vector<2x128xf32>
    %12 = arith.mulf %9, %11 : vector<2x128xf32>
    %13 = arith.addf %7, %12 : vector<2x128xf32>
    %c0_11 = arith.constant 0 : index
    %c2 = arith.constant 2 : index
    %c0_12 = arith.constant 0 : index
    %c0_13 = arith.constant 0 : index
    %14 = vector.load %arg2[%c0_11, %c2, %c0_12, %c0_13] : memref<1x4x2x128xf32, #tpu.memory_space<vmem>>, vector<1x1x2x128xf32>
    %15 = vector.shape_cast %14 : vector<1x1x2x128xf32> to vector<2x128xf32>
    %c0_14 = arith.constant 0 : index
    %c2_15 = arith.constant 2 : index
    %16 = memref.load %arg3[%c0_14, %c2_15] : memref<3x4xf32, #tpu.memory_space<smem>>
    %17 = vector.broadcast %16 : f32 to vector<2x128xf32>
    %18 = arith.mulf %15, %17 : vector<2x128xf32>
    %19 = arith.addf %13, %18 : vector<2x128xf32>
    %c0_16 = arith.constant 0 : index
    %c3 = arith.constant 3 : index
    %c0_17 = arith.constant 0 : index
    %c0_18 = arith.constant 0 : index
    %20 = vector.load %arg2[%c0_16, %c3, %c0_17, %c0_18] : memref<1x4x2x128xf32, #tpu.memory_space<vmem>>, vector<1x1x2x128xf32>
    %21 = vector.shape_cast %20 : vector<1x1x2x128xf32> to vector<2x128xf32>
    %c0_19 = arith.constant 0 : index
    %c3_20 = arith.constant 3 : index
    %22 = memref.load %arg3[%c0_19, %c3_20] : memref<3x4xf32, #tpu.memory_space<smem>>
    %23 = vector.broadcast %22 : f32 to vector<2x128xf32>
    %24 = arith.mulf %21, %23 : vector<2x128xf32>
    %25 = arith.addf %19, %24 : vector<2x128xf32>
    %c0_21 = arith.constant 0 : index
    %c0_22 = arith.constant 0 : index
    %c0_23 = arith.constant 0 : index
    %c0_24 = arith.constant 0 : index
    %26 = vector.load %arg5[%c0_21, %c0_22, %c0_23, %c0_24] : memref<1x3x2x128xf32, #tpu.memory_space<vmem>>, vector<1x1x2x128xf32>
    %27 = vector.shape_cast %26 : vector<1x1x2x128xf32> to vector<2x128xf32>
    %28 = vector.shape_cast %25 : vector<2x128xf32> to vector<1x1x2x128xf32>
    tpu.vector_store %arg5[%c0_21, %c0_22, %c0_23, %c0_24], %28 {strides = array<i32>} : memref<1x3x2x128xf32, #tpu.memory_space<vmem>>, vector<1x1x2x128xf32>,
    %c0_25 = arith.constant 0 : index
    %c0_26 = arith.constant 0 : index
    %c0_27 = arith.constant 0 : index
    %c0_28 = arith.constant 0 : index
    %29 = vector.load %arg2[%c0_25, %c0_26, %c0_27, %c0_28] : memref<1x4x2x128xf32, #tpu.memory_space<vmem>>, vector<1x1x2x128xf32>
    %30 = vector.shape_cast %29 : vector<1x1x2x128xf32> to vector<2x128xf32>
    %c1_29 = arith.constant 1 : index
    %c0_30 = arith.constant 0 : index
    %31 = memref.load %arg3[%c1_29, %c0_30] : memref<3x4xf32, #tpu.memory_space<smem>>
    %32 = vector.broadcast %31 : f32 to vector<2x128xf32>
    %33 = arith.mulf %30, %32 : vector<2x128xf32>
    %c1_31 = arith.constant 1 : index
    %34 = memref.load %arg4[%c1_31] : memref<3xf32, #tpu.memory_space<smem>>
    %35 = vector.broadcast %34 : f32 to vector<2x128xf32>
    %36 = arith.addf %33, %35 : vector<2x128xf32>
    %c0_32 = arith.constant 0 : index
    %c1_33 = arith.constant 1 : index
    %c0_34 = arith.constant 0 : index
    %c0_35 = arith.constant 0 : index
    %37 = vector.load %arg2[%c0_32, %c1_33, %c0_34, %c0_35] : memref<1x4x2x128xf32, #tpu.memory_space<vmem>>, vector<1x1x2x128xf32>
    %38 = vector.shape_cast %37 : vector<1x1x2x128xf32> to vector<2x128xf32>
    %c1_36 = arith.constant 1 : index
    %c1_37 = arith.constant 1 : index
    %39 = memref.load %arg3[%c1_36, %c1_37] : memref<3x4xf32, #tpu.memory_space<smem>>
    %40 = vector.broadcast %39 : f32 to vector<2x128xf32>
    %41 = arith.mulf %38, %40 : vector<2x128xf32>
    %42 = arith.addf %36, %41 : vector<2x128xf32>
    %c0_38 = arith.constant 0 : index
    %c2_39 = arith.constant 2 : index
    %c0_40 = arith.constant 0 : index
    %c0_41 = arith.constant 0 : index
    %43 = vector.load %arg2[%c0_38, %c2_39, %c0_40, %c0_41] : memref<1x4x2x128xf32, #tpu.memory_space<vmem>>, vector<1x1x2x128xf32>
    %44 = vector.shape_cast %43 : vector<1x1x2x128xf32> to vector<2x128xf32>
    %c1_42 = arith.constant 1 : index
    %c2_43 = arith.constant 2 : index
    %45 = memref.load %arg3[%c1_42, %c2_43] : memref<3x4xf32, #tpu.memory_space<smem>>
    %46 = vector.broadcast %45 : f32 to vector<2x128xf32>
    %47 = arith.mulf %44, %46 : vector<2x128xf32>
    %48 = arith.addf %42, %47 : vector<2x128xf32>
    %c0_44 = arith.constant 0 : index
    %c3_45 = arith.constant 3 : index
    %c0_46 = arith.constant 0 : index
    %c0_47 = arith.constant 0 : index
    %49 = vector.load %arg2[%c0_44, %c3_45, %c0_46, %c0_47] : memref<1x4x2x128xf32, #tpu.memory_space<vmem>>, vector<1x1x2x128xf32>
    %50 = vector.shape_cast %49 : vector<1x1x2x128xf32> to vector<2x128xf32>
    %c1_48 = arith.constant 1 : index
    %c3_49 = arith.constant 3 : index
    %51 = memref.load %arg3[%c1_48, %c3_49] : memref<3x4xf32, #tpu.memory_space<smem>>
    %52 = vector.broadcast %51 : f32 to vector<2x128xf32>
    %53 = arith.mulf %50, %52 : vector<2x128xf32>
    %54 = arith.addf %48, %53 : vector<2x128xf32>
    %c0_50 = arith.constant 0 : index
    %c1_51 = arith.constant 1 : index
    %c0_52 = arith.constant 0 : index
    %c0_53 = arith.constant 0 : index
    %55 = vector.load %arg5[%c0_50, %c1_51, %c0_52, %c0_53] : memref<1x3x2x128xf32, #tpu.memory_space<vmem>>, vector<1x1x2x128xf32>
    %56 = vector.shape_cast %55 : vector<1x1x2x128xf32> to vector<2x128xf32>
    %57 = vector.shape_cast %54 : vector<2x128xf32> to vector<1x1x2x128xf32>
    tpu.vector_store %arg5[%c0_50, %c1_51, %c0_52, %c0_53], %57 {strides = array<i32>} : memref<1x3x2x128xf32, #tpu.memory_space<vmem>>, vector<1x1x2x128xf32>,
    %c0_54 = arith.constant 0 : index
    %c0_55 = arith.constant 0 : index
    %c0_56 = arith.constant 0 : index
    %c0_57 = arith.constant 0 : index
    %58 = vector.load %arg2[%c0_54, %c0_55, %c0_56, %c0_57] : memref<1x4x2x128xf32, #tpu.memory_space<vmem>>, vector<1x1x2x128xf32>
    %59 = vector.shape_cast %58 : vector<1x1x2x128xf32> to vector<2x128xf32>
    %c2_58 = arith.constant 2 : index
    %c0_59 = arith.constant 0 : index
    %60 = memref.load %arg3[%c2_58, %c0_59] : memref<3x4xf32, #tpu.memory_space<smem>>
    %61 = vector.broadcast %60 : f32 to vector<2x128xf32>
    %62 = arith.mulf %59, %61 : vector<2x128xf32>
    %c2_60 = arith.constant 2 : index
    %63 = memref.load %arg4[%c2_60] : memref<3xf32, #tpu.memory_space<smem>>
    %64 = vector.broadcast %63 : f32 to vector<2x128xf32>
    %65 = arith.addf %62, %64 : vector<2x128xf32>
    %c0_61 = arith.constant 0 : index
    %c1_62 = arith.constant 1 : index
    %c0_63 = arith.constant 0 : index
    %c0_64 = arith.constant 0 : index
    %66 = vector.load %arg2[%c0_61, %c1_62, %c0_63, %c0_64] : memref<1x4x2x128xf32, #tpu.memory_space<vmem>>, vector<1x1x2x128xf32>
    %67 = vector.shape_cast %66 : vector<1x1x2x128xf32> to vector<2x128xf32>
    %c2_65 = arith.constant 2 : index
    %c1_66 = arith.constant 1 : index
    %68 = memref.load %arg3[%c2_65, %c1_66] : memref<3x4xf32, #tpu.memory_space<smem>>
    %69 = vector.broadcast %68 : f32 to vector<2x128xf32>
    %70 = arith.mulf %67, %69 : vector<2x128xf32>
    %71 = arith.addf %65, %70 : vector<2x128xf32>
    %c0_67 = arith.constant 0 : index
    %c2_68 = arith.constant 2 : index
    %c0_69 = arith.constant 0 : index
    %c0_70 = arith.constant 0 : index
    %72 = vector.load %arg2[%c0_67, %c2_68, %c0_69, %c0_70] : memref<1x4x2x128xf32, #tpu.memory_space<vmem>>, vector<1x1x2x128xf32>
    %73 = vector.shape_cast %72 : vector<1x1x2x128xf32> to vector<2x128xf32>
    %c2_71 = arith.constant 2 : index
    %c2_72 = arith.constant 2 : index
    %74 = memref.load %arg3[%c2_71, %c2_72] : memref<3x4xf32, #tpu.memory_space<smem>>
    %75 = vector.broadcast %74 : f32 to vector<2x128xf32>
    %76 = arith.mulf %73, %75 : vector<2x128xf32>
    %77 = arith.addf %71, %76 : vector<2x128xf32>
    %c0_73 = arith.constant 0 : index
    %c3_74 = arith.constant 3 : index
    %c0_75 = arith.constant 0 : index
    %c0_76 = arith.constant 0 : index
    %78 = vector.load %arg2[%c0_73, %c3_74, %c0_75, %c0_76] : memref<1x4x2x128xf32, #tpu.memory_space<vmem>>, vector<1x1x2x128xf32>
    %79 = vector.shape_cast %78 : vector<1x1x2x128xf32> to vector<2x128xf32>
    %c2_77 = arith.constant 2 : index
    %c3_78 = arith.constant 3 : index
    %80 = memref.load %arg3[%c2_77, %c3_78] : memref<3x4xf32, #tpu.memory_space<smem>>
    %81 = vector.broadcast %80 : f32 to vector<2x128xf32>
    %82 = arith.mulf %79, %81 : vector<2x128xf32>
    %83 = arith.addf %77, %82 : vector<2x128xf32>
    %c0_79 = arith.constant 0 : index
    %c2_80 = arith.constant 2 : index
    %c0_81 = arith.constant 0 : index
    %c0_82 = arith.constant 0 : index
    %84 = vector.load %arg5[%c0_79, %c2_80, %c0_81, %c0_82] : memref<1x3x2x128xf32, #tpu.memory_space<vmem>>, vector<1x1x2x128xf32>
    %85 = vector.shape_cast %84 : vector<1x1x2x128xf32> to vector<2x128xf32>
    %86 = vector.shape_cast %83 : vector<2x128xf32> to vector<1x1x2x128xf32>
    tpu.vector_store %arg5[%c0_79, %c2_80, %c0_81, %c0_82], %86 {strides = array<i32>} : memref<1x3x2x128xf32, #tpu.memory_space<vmem>>, vector<1x1x2x128xf32>,
    return
  }
  func.func @transform_0(%arg0: i32, %arg1: i32) -> (i32, i32, i32, i32) {
    %c0_i32 = arith.constant 0 : i32
    %c0_i32_0 = arith.constant 0 : i32
    %c0_i32_1 = arith.constant 0 : i32
    return %arg0, %c0_i32, %arg1, %c0_i32_0 : i32, i32, i32, i32
  }
  func.func @transform_1(%arg0: i32, %arg1: i32) -> (i32, i32) {
    %c0_i32 = arith.constant 0 : i32
    %c0_i32_0 = arith.constant 0 : i32
    %c0_i32_1 = arith.constant 0 : i32
    return %c0_i32, %c0_i32_0 : i32, i32
  }
  func.func @transform_2(%arg0: i32, %arg1: i32) -> i32 {
    %c0_i32 = arith.constant 0 : i32
    %c0_i32_0 = arith.constant 0 : i32
    return %c0_i32 : i32
  }
  func.func @transform_3(%arg0: i32, %arg1: i32) -> (i32, i32, i32, i32) {
    %c0_i32 = arith.constant 0 : i32
    %c0_i32_0 = arith.constant 0 : i32
    %c0_i32_1 = arith.constant 0 : i32
    return %arg0, %c0_i32, %arg1, %c0_i32_0 : i32, i32, i32, i32
  }
}

</mosaic_0001>

<bundles_post_ra>
// kernel: tpu_custom_call.1
= control target key start
LH: loop header
LB: loop body
LE: loop exit
PB: predicated region body
PF: predicated region fallthrough
CT: control target
= control target key end

     0   :  { %8 = vsyncpa [#allocation3], 0  ;;  %s1001_s0 = inlined_call_operand.hbm [shape: f32[2,4,2,128], index: 0, kind: input, shape index: {}]   ;;  %s1002_s1 = inlined_call_operand.hbm [shape: f32[3,4], index: 1, kind: input, shape index: {}]   ;;  %s1003_s2 = inlined_call_operand.vmem [shape: f32[3], index: 2, kind: input, shape index: {}]   ;;  %s1004_s3 = inlined_call_operand.hbm [shape: f32[2,3,2,128], index: 3, kind: output, shape index: {}]  }
   0x1   :  { %10 = vsyncpa [#allocation3 + $0x1], 0 }
   0x2   :  { %11 = vsyncpa [#allocation5], 0 }
   0x3   :  { %12 = vsyncpa [#allocation6], 0 }
   0x4   :  { %13 = vsyncpa [#allocation4], 0 }
   0x5   :  { %15 = vsyncpa [#allocation4 + $0x1], 0  ;;  %s737_s12 = smov 0   ;;  %s739_s13 = smov 0  }
   0x6   :  { %s741_s14 = smov 0   ;;  %s743_s15 = smov 0  }
   0x7   :  { %s745_s16 = smov 0   ;;  %s747_s17 = smov 0  }
   0x8 LB: > { %s429_s18 = sadd.s32 4294967295, %s707_s17   ;;  %s430_s19 = sadd.s32 4294967294, %s707_s17   ;;  %s707_s17 = sphi %s747_s17, %s21_s17   ;;  %s703_s16 = sphi %s745_s16, %s1025_s16   ;;  %s699_s15 = sphi %s743_s15, %s1024_s15   ;;  %s695_s14 = sphi %s741_s14, %s1023_s14   ;;  %s691_s13 = sphi %s739_s13, %s1022_s13   ;;  %s687_s12 = sphi %s737_s12, %s1021_s12  }
   0x9   : > { %s42_s20 = sadd.s32 1, %s695_s14  ;;  %p49_p0 = scmp.ne.s32.totalorder %s695_s14, %s691_s13 }
   0xa   : > { %p50_p1 = scmp.eq.s32.totalorder %s707_s17, 0  ;;  %p55_p2 = scmp.ne.s32.totalorder %s691_s13, %s687_s12 }
   0xb   : > { %p775_p3 = scmp.eq.s32.totalorder %s429_s18, 0  ;;  %p123_p4 = scmp.eq.s32.totalorder %s429_s18, 1 }
   0xc   : > { %p51_p5 = por %p50_p1, %p49_p0  ;;  %p129_p6 = scmp.eq.s32.totalorder %s430_s19, 1 }
   0xd   : > { %s1009_s21 = scalar_select %p775_p3, 1, 0 }
   0xe   : > { %p781_p7 = por %p775_p3, %p55_p2  ;;  %p785_p8 = por %p123_p4, %p49_p0 }
   0xf   : > { %p789_p9 = por %p129_p6, %p55_p2  ;;  %p431_p10 = scmp.ge.s32.totalorder %s707_s17, 1 }
  0x10   : > { %s1010_s22 = scalar_select %p781_p7, 1, 0 }
  0x11   : > { %s1011_s23 = scalar_select %p785_p8, 1, 0 }
  0x12   : > { %s1012_s24 = scalar_select %p789_p9, 1, 0 }
  0x13   : > { %p136_p11 = scmp.lt.s32.totalorder %s707_s17, 3  ;;  %p501_p1 = scmp.lt.s32.totalorder %s707_s17, 2 }
  0x14   : > { %s158_s28 = sshll.u32 %s1003_s2, 4  ;;  %s169_s4 = sand.u32 1, %s695_s14   ;;  %s159_s28 = int_to_ptr.vmem [resolvable:$true] %s158_s28 }
  0x15   : > { %p796_p13 = pnand %p431_p10, %p136_p11  ;;  %p806_p4 = pnand %p501_p1, %p51_p5 }
  0x16   : > { %s33_s5 = sadd.s32 1, %s703_s16  ;;  %s559_s8 = scalar_lea.hbm %s1002_s1, 64 }
  0x17   : > { %p484_p0 = pneg %p796_p13  ;;  %p560_p5 = scmp.ne.s32.totalorder %s1002_s1, %s559_s8 }
  0x18   : > { %p566_p1 = scmp.lt.u32.totalorder %s559_s8, %s1002_s1 }
  0x19   : > { %p812_p2 = pnand %p484_p0, %p775_p3 }
  0x1b   : > { %p561_p6 = pneg %p812_p2 }
  0x1d   : > { %p562_p10 = pnand %p561_p6, %p560_p5 }
  0x1f   : > { %p563_p11 = pneg %p562_p10 }
  0x21   : > { %p568_p0 = pnand %p566_p1, %p563_p11 }
  0x23   : > { %571 = shalt.err (!%p568_p0)
}
  0x24   : > { %s709_s19 = smov [#allocation7]   ;;  %s572_s6 = scalar_lea.vmem %s159_s28, 16 }
  0x25   : > { %487 = dma.hbm_to_smem (!%p812_p2), %s1002_s1, 64, %s709_s19, [#allocation5]  }
  0x26   : > { %p573_p12 = scmp.ne.s32.totalorder %s159_s28, %s572_s6  ;;  %p580_p3 = scmp.lt.s32.totalorder %s159_s28, %s159_s28 }
  0x27   : > { %p581_p5 = scmp.lt.s32.totalorder %s572_s6, %s572_s6 }
  0x28   : > { %p575_p9 = pnand %p573_p12, %p561_p6 }
  0x29   : > { %p582_p10 = por %p581_p5, %p580_p3 }
  0x2a   : > { %p576_p8 = pneg %p575_p9 }
  0x2c   : > { %p583_p7 = pnand %p582_p10, %p576_p8 }
  0x2e   : > { %586 = shalt.err (!%p583_p7)
}
  0x2f   : > { %s710_s7 = smov [#allocation8]   ;;  %p35_p11 = scmp.ge.s32.totalorder %s33_s5, 2 }
  0x30   : > { %490 = dma.vmem_to_smem (!%p812_p2), %s159_s28, 16, %s710_s7, [#allocation6]  }
  0x31   : > { %s435_s8 = sshll.u32 %s169_s4, 3  ;;  %s469_s9 = sshll.u32 %s703_s16, 7 }
  0x32   : > { %s1027_s5 = smov (%p35_p11, %s33_s5), 0  ;;  %s844_s30 = scalar_lea.hbm %s1001_s0, %s469_s9 }
  0x33   : > { %s37_s18 = ssub.s32 %s703_s16, %s1027_s5  ;;  %s173_s19 = scalar_lea.vmem [#allocation2], %s435_s8 }
  0x34   : > { %s181_s28 = sshll.u32 %s173_s19, 4  ;;  %p40_p3 = scmp.eq.s32.totalorder %s37_s18, 0  ;;  %s848_s28 = int_to_ptr.vmem [resolvable:$true] %s181_s28 }
  0x35   : > { %s857_s27 = scalar_lea.sflag [#allocation3], %s169_s4  ;;  %s587_s6 = scalar_lea.hbm %s844_s30, 128 }
  0x36   : > { %s853_s26 = scalar_select %p40_p3, %s695_s14, %s42_s20  }
  0x37   : > { %p588_p7 = scmp.ne.s32.totalorder %s844_s30, %s587_s6  ;;  %p589_p8 = pneg %p806_p4 }
  0x38   : > { %s592_s9 = scalar_lea.hbm %s1001_s0, 256  ;;  %p593_p2 = scmp.lt.u32.totalorder %s844_s30, %s1001_s0 }
  0x39   : > { %p590_p9 = pnand %p589_p8, %p588_p7  ;;  %p594_p6 = scmp.lt.u32.totalorder %s592_s9, %s587_s6 }
  0x3a   : > { %p596_p0 = scmp.lt.u32.totalorder %s587_s6, %s844_s30 }
  0x3b   : > { %p591_p12 = pneg %p590_p9  ;;  %p595_p1 = por %p594_p6, %p593_p2 }
  0x3d   : > { %p597_p5 = por %p596_p0, %p595_p1 }
  0x3f   : > { %p598_p10 = pnand %p597_p5, %p591_p12 }
  0x41   : > { %601 = shalt.err (!%p598_p10)
}
  0x42   : > { %s602_s20 = scalar_lea.vmem %s848_s28, 128  ;;  %s711_s4 = smov [#allocation2]  }
  0x43   : > { %p603_p11 = scmp.ne.s32.totalorder %s848_s28, %s602_s20  ;;  %s607_s18 = sshll.u32 %s711_s4, 4  ;;  %s608_s18 = int_to_ptr.vmem [resolvable:$false] %s607_s18 }
  0x44   : > { %s609_s19 = scalar_lea.vmem %s608_s18, 256  ;;  %p610_p9 = scmp.lt.s32.totalorder %s848_s28, %s608_s18 }
  0x45   : > { %p605_p3 = pnand %p603_p11, %p589_p8  ;;  %p611_p2 = scmp.lt.s32.totalorder %s609_s19, %s602_s20 }
  0x47   : > { %p606_p7 = pneg %p605_p3  ;;  %p612_p6 = por %p611_p2, %p610_p9 }
  0x49   : > { %p613_p1 = pnand %p612_p6, %p606_p7 }
  0x4b   : > { %616 = shalt.err (!%p613_p1)
}
  0x4c   : > { %s712_s6 = smov 32   ;;  %s713_s7 = smov 2  }
  0x4d   : > { %494 = dma.hbm_to_vmem [thread:$0]  (!%p806_p4), %s844_s30, 128, %s848_s28, %s857_s27, %s712_s6, %s712_s6, %s713_s7  }
  0x4e   : > { %193 = sbr.rel (%p796_p13) target bundleno = 131 (0x83), region = 32  ;;  %s888_s8 = sand.u32 (!%p796_p13), 1, %s691_s13  }
  0x4f   : > { %s439_s9 = sshll.u32 (!%p796_p13), %s888_s8, 3  ;;  %s196_s10 = scalar_lea.sflag (!%p796_p13), [#allocation3], %s888_s8 }
  0x50   : > { %s892_s11 = scalar_lea.vmem (!%p796_p13), [#allocation2], %s439_s9  ;;  %p1016_p8 = scmp.ne.s32.totalorder (!%p796_p13), %s1010_s22, 0 }
  0x55   : > { %670 = dma.done.wait (%p1016_p8), %s196_s10, 128  }
  0x56   : > { %672 = vsyncadd (%p1016_p8), %s196_s10, 4294967168  ;;  %p1017_p4 = scmp.ne.s32.totalorder %s1009_s21, 0 }
  0x58   : > { %674 = dma.done.wait (%p1017_p4), [#allocation5], 64  }
  0x59   : > { %676 = vsyncadd (%p1017_p4), [#allocation5], 4294967232 }
  0x5a   : > { %678 = dma.done.wait (%p1017_p4), [#allocation6], 16  }
  0x5b   : > { %680 = vsyncadd (%p1017_p4), [#allocation6], 4294967280 }
  0x5c   : > { %212 = sfence }
  0x5d   : > { %s232_s25 = sld [smem:[#allocation7]]  ;;  %s443_s22 = sld [smem:[#allocation7 + $0x1]]  ;;  %v231_v0 = vld [vmem:[%s892_s11] sm:$0x3]  ;;  %v442_v1 = vld [vmem:[%s892_s11 + $0x2] sm:$0x3] }
  0x5e   : > { %s235_s29 = sld [smem:[#allocation8]]  ;;  %s445_s30 = sld [smem:[#allocation7 + $0x2]]  ;;  %v444_v3 = vld [vmem:[%s892_s11 + $0x4] sm:$0x3]  ;;  %v446_v7 = vld [vmem:[%s892_s11 + $0x6] sm:$0x3] }
  0x5f   : > { %s447_s28 = sld [smem:[#allocation7 + $0x3]]  ;;  %s448_s27 = sld [smem:[#allocation7 + $0x80]]  ;;  %v257_v10 = vld [vmem:[%s892_s11] sm:$0x3]  ;;  %v450_v14 = vld [vmem:[%s892_s11 + $0x2] sm:$0x3] }
  0x60   : > { %s908_s20 = sld [smem:[#allocation8 + $0x1]]  ;;  %s913_s21 = sld [smem:[#allocation7 + $0x82]]  ;;  %v452_v17 = vld [vmem:[%s892_s11 + $0x4] sm:$0x3]  ;;  %v454_v22 = vld [vmem:[%s892_s11 + $0x6] sm:$0x3] }
  0x61   : > { %s910_s4 = sld [smem:[#allocation7 + $0x81]]  ;;  %s915_s18 = sld [smem:[#allocation7 + $0x83]]  ;;  %v281_v26 = vld [vmem:[%s892_s11] sm:$0x3]  ;;  %v459_v27 = vld [vmem:[%s892_s11 + $0x2] sm:$0x3] }
  0x62   : > { %s918_s19 = sld [smem:[#allocation7 + $0x100]]  ;;  %s920_s6 = sld [smem:[#allocation8 + $0x2]]  ;;  %v461_v35 = vld [vmem:[%s892_s11 + $0x4] sm:$0x3]  ;;  %v463_v41 = vld [vmem:[%s892_s11 + $0x6] sm:$0x3] }
  0x63   : > { %v233_v2 = vstv %s232_s25  ;;  %v241_v6 = vstv %s443_s22  ;;  %s923_s7 = sld [smem:[#allocation7 + $0x101]]  ;;  %s926_s9 = sld [smem:[#allocation7 + $0x102]] }
  0x64   : > { %v234_v4 = vmul.f32 %v233_v2, %v231_v0  ;;  %v236_v5 = vstv %s235_s29  ;;  %v242_v8 = vmul.f32 %v442_v1, %v241_v6  ;;  %v247_v9 = vstv %s445_s30  ;;  %s928_s10 = sld [smem:[#allocation7 + $0x103]]  ;;  %s470_s25 = smul.u32 6, %s888_s8 }
  0x65   : > { %v248_v12 = vmul.f32 %v444_v3, %v247_v9  ;;  %v253_v13 = vstv %s447_s28  ;;  %v259_v16 = vstv %s448_s27  ;;  %s471_s30 = smul.u32 96, %s699_s15  ;;  %p1018_p12 = scmp.ne.s32.totalorder %s1011_s23, 0 }
  0x66   : > { %v237_v11 = vadd.f32 %v236_v5, %v234_v4  ;;  %v254_v15 = vmul.f32 %v446_v7, %v253_v13  ;;  %v260_v19 = vmul.f32 %v259_v16, %v257_v10  ;;  %v262_v20 = vstv %s908_s20  ;;  %s230_s29 = scalar_lea.vmem [#allocation9], %s470_s25  ;;  %s306_s20 = scalar_lea.sflag [#allocation4], %s888_s8 }
  0x67   : > { %v266_v21 = vstv %s910_s4  ;;  %v271_v24 = vstv %s913_s21  ;;  %v276_v25 = vstv %s915_s18  ;;  %s320_s22 = sshll.u32 %s230_s29, 4  ;;  %s952_s27 = scalar_lea.hbm %s1004_s3, %s471_s30  ;;  %s947_s22 = int_to_ptr.vmem [resolvable:$true] %s320_s22 }
  0x68   : > { %v243_v18 = vadd.f32 %v242_v8, %v237_v11  ;;  %v267_v23 = vmul.f32 %v450_v14, %v266_v21  ;;  %v263_v29 = vadd.f32 %v262_v20, %v260_v19  ;;  %v272_v30 = vmul.f32 %v452_v17, %v271_v24  ;;  %s617_s4 = scalar_lea.vmem %s947_s22, 96  ;;  %s714_s15 = smov [#allocation9]  }
  0x69   : > { %v277_v31 = vmul.f32 %v454_v22, %v276_v25  ;;  %v283_v32 = vstv %s918_s19  ;;  %v286_v33 = vstv %s920_s6  ;;  %v290_v34 = vstv %s923_s7  ;;  %p618_p13 = scmp.ne.s32.totalorder %s947_s22, %s617_s4  ;;  %s621_s21 = sshll.u32 %s714_s15, 4  ;;  %s622_s21 = int_to_ptr.vmem [resolvable:$false] %s621_s21 }
  0x6a   : > { %v249_v28 = vadd.f32 %v248_v12, %v243_v18  ;;  %v268_v37 = vadd.f32 %v267_v23, %v263_v29  ;;  %v284_v38 = vmul.f32 %v283_v32, %v281_v26  ;;  %v291_v39 = vmul.f32 %v459_v27, %v290_v34  ;;  %s623_s18 = scalar_lea.vmem %s622_s21, 192  ;;  %p624_p10 = scmp.lt.s32.totalorder %s947_s22, %s622_s21 }
  0x6b   : > { %v295_v40 = vstv %s926_s9  ;;  %v300_v42 = vstv %s928_s10  ;;  %p619_p0 = pnand %p618_p13, %p1018_p12  ;;  %p625_p11 = scmp.lt.s32.totalorder %s623_s18, %s617_s4 }
  0x6c   : > { %v255_v36 = vadd.f32 %v254_v15, %v249_v28  ;;  %v273_v43 = vadd.f32 %v272_v30, %v268_v37  ;;  %v287_v44 = vadd.f32 %v286_v33, %v284_v38  ;;  %v296_v45 = vmul.f32 %v461_v35, %v295_v40 }
  0x6d   : > { %v301_v48 = vmul.f32 %v463_v41, %v300_v42  ;;  %p620_p5 = pneg %p619_p0  ;;  %p626_p3 = por %p625_p11, %p624_p10 }
  0x6e   : > { %256 = vst [vmem:[%s230_s29] sm:$0x3] %v255_v36  ;;  %v278_v46 = vadd.f32 %v277_v31, %v273_v43  ;;  %v292_v47 = vadd.f32 %v291_v39, %v287_v44 }
  0x6f   : > { %p627_p7 = pnand %p626_p3, %p620_p5 }
  0x70   : > { %456 = vst [vmem:[%s230_s29 + $0x2] sm:$0x3] %v278_v46  ;;  %v297_v49 = vadd.f32 %v296_v45, %v292_v47 }
  0x72   : > { %v302_v50 = vadd.f32 %v301_v48, %v297_v49 }
  0x74   : > { %465 = vst [vmem:[%s230_s29 + $0x4] sm:$0x3] %v302_v50 }
  0x75   : > { %630 = shalt.err (!%p627_p7)
}
  0x76   : > { %s631_s19 = scalar_lea.hbm %s952_s27, 96  ;;  %s635_s9 = scalar_lea.hbm %s1004_s3, 192 }
  0x77   : > { %p632_p9 = scmp.ne.s32.totalorder %s952_s27, %s631_s19  ;;  %p636_p1 = scmp.lt.u32.totalorder %s952_s27, %s1004_s3 }
  0x78   : > { %p637_p8 = scmp.lt.u32.totalorder %s635_s9, %s631_s19  ;;  %p639_p13 = scmp.lt.u32.totalorder %s631_s19, %s952_s27 }
  0x79   : > { %p633_p2 = pnand %p632_p9, %p1018_p12 }
  0x7a   : > { %p638_p4 = por %p637_p8, %p636_p1 }
  0x7b   : > { %p634_p6 = pneg %p633_p2 }
  0x7c   : > { %p640_p0 = por %p639_p13, %p638_p4 }
  0x7e   : > { %p641_p5 = pnand %p640_p0, %p634_p6 }
  0x80   : > { %644 = shalt.err (!%p641_p5)
}
  0x81   : > { %s715_s29 = smov 32   ;;  %s716_s30 = smov 2  }
  0x82   : > { %482 = dma.vmem_to_hbm [thread:$0]  (%p1018_p12), %s947_s22, 96, %s952_s27, %s306_s20, %s715_s29, %s715_s29, %s716_s30  }
  0x83 PF: > { %s335_s11 = sand.u32 1, %s687_s12   ;;  %p1019_p10 = scmp.ne.s32.totalorder %s1012_s24, 0 }
  0x84   : > { %p1020_p11 = scmp.ge.s32.totalorder %s707_s17, 2  ;;  %s336_s28 = scalar_lea.sflag [#allocation4], %s335_s11 }
  0x86   : > { %p496_p3 = pnand %p1020_p11, %p1019_p10 }
  0x88   : > { %682 = dma.done.wait (!%p496_p3), %s336_s28, 96  }
  0x89   : > { %684 = vsyncadd (!%p496_p3), %s336_s28, 4294967200  ;;  %s21_s17 = sadd.s32 1, %s707_s17   ;;  %s1021_s12 = smov %s691_s13 }
  0x8a   : > { %p18_p7 = scmp.ge.s32.totalorder %s21_s17, 4   ;;  %s1022_s13 = smov %s695_s14 }
  0x8b   : > { %s1023_s14 = smov %s853_s26  ;;  %s1024_s15 = smov %s703_s16 }
  0x8c   : > { %s1025_s16 = smov %s1027_s5  ;;  %20 = sbr.rel (!%p18_p7) target bundleno = 8 (0x8), region = 92 }
  0x93   :  { %341 = vsyncpa [#allocation3], 1 }
  0x94   :  { %343 = vsyncpa [#allocation3 + $0x1], 1 }
  0x95   :  { %344 = vsyncpa [#allocation4], 1 }
  0x96   :  { %346 = vsyncpa [#allocation4 + $0x1], 1 }
  0x97   :  { %347 = vsyncpa [#allocation5], 1 }
  0x98   :  { %349 = vsyncpa [#allocation5 + $0x1], 1 }
  0x99   :  { %350 = vsyncpa [#allocation6], 1 }
  0x9a   :  { %352 = vsyncpa [#allocation6 + $0x1], 1 }

</bundles_post_ra>
